<compile_context>
chip_gen: v7x
topology: tpu7x:2x2x1
jax: 0.10.0
libtpu: 0.0.40
codegen_flags: <defaults>
</compile_context>

<pallas_src>
import functools

import numpy as np
import jax
import jax.numpy as jnp
from jax.experimental import pallas as pl
from jax.experimental.pallas import tpu as pltpu

CLASS_COUNT = 14
BN_EPS = 1e-5

GROWTH = 32                      # densenet201 growth rate
BN_SIZE = 4                      # bottleneck width multiplier (-> 128)
INIT_FEATURES = 64
BLOCK_CONFIG = (6, 12, 48, 32)   # densenet201 dense-block layer counts

_BN_GAMMA = 0.8
_BN_BETA = 0.02
_VMEM_LIMIT = 32 * 1024 * 1024   # explicit scoped-VMEM limit; tiles are far smaller
_S2_FOLD = float(_BN_GAMMA / np.sqrt(1.0 + BN_EPS))   # post-conv BN scale (folded)


def _ru(x, m):
    return (x + m - 1) // m * m


# ----------------------------------------------------------------------------
# Kernel 1: tiled fused matmul  (1x1 convs, stem im2col conv, transitions)
#     out = [relu]( [relu(x * si + bi)] @ w  [+ bo] )
# Grid (M/tm, N/tn, K/tk), f32 accumulator in VMEM, bf16 MXU operands.
# ----------------------------------------------------------------------------
def _mm_kernel(x_ref, si_ref, bi_ref, w_ref, bo_ref, o_ref, acc_ref,
               *, in_act, out_bias, out_relu):
    k = pl.program_id(2)

    @pl.when(k == 0)
    def _init():
        acc_ref[...] = jnp.zeros_like(acc_ref)

    x = x_ref[...]
    if in_act:                                  # pre-activation BN + ReLU (f32 VPU)
        x = jnp.maximum(x.astype(jnp.float32) * si_ref[...] + bi_ref[...], 0.0)
        x = x.astype(w_ref.dtype)
    acc_ref[...] += jnp.dot(x, w_ref[...], preferred_element_type=jnp.float32)

    @pl.when(k == pl.num_programs(2) - 1)
    def _finalize():
        y = acc_ref[...]
        if out_bias:
            y = y + bo_ref[...]
        if out_relu:
            y = jnp.maximum(y, 0.0)
        o_ref[...] = y.astype(o_ref.dtype)


@functools.lru_cache(maxsize=None)
def _build_mm(Mp, Kp, Np, tm, tn, tk, in_act, out_bias, out_relu):
    gm, gn, gk = Mp // tm, Np // tn, Kp // tk
    return pl.pallas_call(
        functools.partial(_mm_kernel, in_act=in_act, out_bias=out_bias,
                          out_relu=out_relu),
        out_shape=jax.ShapeDtypeStruct((Mp, Np), jnp.bfloat16),
        grid=(gm, gn, gk),
        in_specs=[
            pl.BlockSpec((tm, tk), lambda i, j, k: (i, k)),
            pl.BlockSpec((1, tk), lambda i, j, k: (0, k)),
            pl.BlockSpec((1, tk), lambda i, j, k: (0, k)),
            pl.BlockSpec((tk, tn), lambda i, j, k: (k, j)),
            pl.BlockSpec((1, tn), lambda i, j, k: (0, j)),
        ],
        out_specs=pl.BlockSpec((tm, tn), lambda i, j, k: (i, j)),
        scratch_shapes=[pltpu.VMEM((tm, tn), jnp.float32)],
        compiler_params=pltpu.CompilerParams(
            dimension_semantics=("parallel", "parallel", "arbitrary"),
            vmem_limit_bytes=_VMEM_LIMIT),
        cost_estimate=pl.CostEstimate(
            flops=2 * Mp * Kp * Np, transcendentals=0,
            bytes_accessed=2 * (Mp * Kp + Kp * Np + Mp * Np)),
    )


def fused_matmul(x2d, w_pad, in_aff=None, out_b=None, out_relu=False):
    """x2d: (M, K).  w_pad: (Kp, Np) bf16, Kp multiple of 256, Np multiple of
    128.  Returns (M, Np) bf16; caller slices the valid N columns."""
    M, K = x2d.shape
    Kp, Np = w_pad.shape
    if _ru(M, 8) > 256:
        Mp, tm = _ru(M, 256), 256
    else:
        Mp = tm = _ru(M, 8)
    tn, tk = 128, 256

    xp = jnp.pad(x2d, ((0, Mp - M), (0, Kp - K))).astype(jnp.bfloat16)
    if in_aff is None:
        si = jnp.zeros((1, Kp), jnp.float32)
        bi = si
    else:
        si, bi = in_aff
    bo = out_b if out_b is not None else jnp.zeros((1, Np), jnp.float32)

    fn = _build_mm(Mp, Kp, Np, tm, tn, tk,
                   in_aff is not None, out_b is not None, bool(out_relu))
    return fn(xp, si, bi, w_pad, bo)[:M]


# ----------------------------------------------------------------------------
# Kernel 2: direct 3x3 conv (stride 1, pad 1) over an already-activated NHWC
# map.  One grid step = one batch item x one output row; the 9 taps are
# accumulated in-kernel, so the activation is streamed ~3x instead of writing
# a 9x im2col tensor to HBM.
# ----------------------------------------------------------------------------
@functools.lru_cache(maxsize=None)
def _build_conv3x3(N, H, W, C, Cout):
    Hp, Wp = H + 2, W + 2

    def kernel(x0_ref, x1_ref, x2_ref, w_ref, o_ref):
        rows = (x0_ref[0], x1_ref[0], x2_ref[0])          # each (Wp, C) bf16
        acc = jnp.zeros((W, Cout), jnp.float32)
        for ky in range(3):
            for kx in range(3):
                tap = rows[ky][kx:kx + W, :]              # (W, C) static slice
                acc = acc + jnp.dot(tap, w_ref[ky, kx],
                                    preferred_element_type=jnp.float32)
        o_ref[...] = acc[None].astype(o_ref.dtype)

    def row_spec(shift):
        return pl.BlockSpec((1, Wp, C),
                            lambda n, h, s=shift: (n * Hp + h + s, 0, 0))

    return pl.pallas_call(
        kernel,
        out_shape=jax.ShapeDtypeStruct((N * H, W, Cout), jnp.bfloat16),
        grid=(N, H),
        in_specs=[row_spec(0), row_spec(1), row_spec(2),
                  pl.BlockSpec((3, 3, C, Cout), lambda n, h: (0, 0, 0, 0))],
        out_specs=pl.BlockSpec((1, W, Cout), lambda n, h: (n * H + h, 0, 0)),
        compiler_params=pltpu.CompilerParams(
            dimension_semantics=("parallel", "parallel"),
            vmem_limit_bytes=_VMEM_LIMIT),
        cost_estimate=pl.CostEstimate(
            flops=2 * N * H * W * 9 * C * Cout, transcendentals=0,
            bytes_accessed=2 * (3 * N * Hp * Wp * C + 9 * C * Cout
                                + N * H * W * Cout)),
    )


def conv3x3(x, w):
    """x: (N, H, W, C) bf16, already BN+ReLU activated.  w: (3,3,C,Cout) bf16."""
    N, H, W, C = x.shape
    Cout = w.shape[-1]
    xp = jnp.pad(x, ((0, 0), (1, 1), (1, 1), (0, 0)))     # zero pad == conv pad
    x2 = xp.reshape(N * (H + 2), W + 2, C)
    out = _build_conv3x3(N, H, W, C, Cout)(x2, x2, x2, w)
    return out.reshape(N, H, W, Cout)


# ----------------------------------------------------------------------------
# Kernel 3: head = norm5 + ReLU + global average pool + Linear + Sigmoid
# ----------------------------------------------------------------------------
def _head_kernel(x_ref, s_ref, b_ref, w_ref, fb_ref, o_ref):
    x = x_ref[...].astype(jnp.float32)                    # (N, HW, C)
    x = jnp.maximum(x * s_ref[...][None] + b_ref[...][None], 0.0)
    pooled = jnp.mean(x, axis=1)                          # (N, C)
    logits = jnp.dot(pooled.astype(w_ref.dtype), w_ref[...],
                     preferred_element_type=jnp.float32) + fb_ref[...]
    o_ref[...] = (1.0 / (1.0 + jnp.exp(-logits))).astype(o_ref.dtype)


@functools.lru_cache(maxsize=None)
def _build_head(N, HW, C, CC):
    # Tiny single-block kernel: x is (N, HW, C) ~ a few KB here.
    return pl.pallas_call(
        _head_kernel,
        out_shape=jax.ShapeDtypeStruct((N, CC), jnp.float32),
        compiler_params=pltpu.CompilerParams(vmem_limit_bytes=_VMEM_LIMIT),
    )


# ----------------------------------------------------------------------------
# Plain-JAX glue (per review: pooling via fused XLA elementwise, no 9x stacks)
# ----------------------------------------------------------------------------
def _im2col(x, kh, kw, stride, pad):
    """Only used for the single 7x7 stem conv (small); the 98 3x3 convs use
    the direct Pallas kernel instead of im2col."""
    N, H, W, C = x.shape
    if pad:
        x = jnp.pad(x, ((0, 0), (pad, pad), (pad, pad), (0, 0)))
    Ho = (H + 2 * pad - kh) // stride + 1
    Wo = (W + 2 * pad - kw) // stride + 1
    cols = []
    for ky in range(kh):
        for kx in range(kw):
            cols.append(x[:, ky:ky + stride * (Ho - 1) + 1:stride,
                             kx:kx + stride * (Wo - 1) + 1:stride, :])
    patches = jnp.concatenate(cols, axis=-1)
    return patches.reshape(N * Ho * Wo, kh * kw * C), (N, Ho, Wo)


def maxpool3x3_s2(x):
    """MaxPool2d(3, stride=2, padding=1) in NHWC via chained jnp.maximum."""
    N, H, W, C = x.shape
    Ho = (H + 2 - 3) // 2 + 1
    Wo = (W + 2 - 3) // 2 + 1
    xp = jnp.pad(x, ((0, 0), (1, 1), (1, 1), (0, 0)), constant_values=-jnp.inf)
    out = None
    for ky in range(3):
        for kx in range(3):
            tap = xp[:, ky:ky + 2 * (Ho - 1) + 1:2,
                        kx:kx + 2 * (Wo - 1) + 1:2, :]
            out = tap if out is None else jnp.maximum(out, tap)
    return out


def avgpool2x2(x):
    N, H, W, C = x.shape
    return x.reshape(N, H // 2, 2, W // 2, 2, C).mean(axis=(2, 4)).astype(x.dtype)


# ----------------------------------------------------------------------------
# Deterministic synthetic parameters (exact densenet201 shapes, eval-mode BN
# folded to scale/bias, post-conv BN scales folded into weights, everything
# pre-padded to MXU-aligned K/N and cast to bf16 at prep time).
# ----------------------------------------------------------------------------
class _Gen:
    def __init__(self, key):
        self.key = key
        self.i = 0

    def normal(self, shape, std):
        self.i += 1
        k = jax.random.fold_in(self.key, self.i)
        return jax.random.normal(k, shape, jnp.float32) * std


def _bn_affine(c, cp):
    """Folded eval-mode BN (mean=0, var=1, gamma, beta) padded to cp entries.
    Padded entries are exactly zero so padded K columns contribute nothing."""
    scale = np.zeros((1, cp), np.float32)
    bias = np.zeros((1, cp), np.float32)
    scale[0, :c] = _BN_GAMMA / np.sqrt(1.0 + BN_EPS)
    bias[0, :c] = _BN_BETA
    return jnp.asarray(scale), jnp.asarray(bias)


def make_densenet201_params(key, class_count):
    g = _Gen(key)
    p = {}

    # --- stem: conv0 7x7/2 (3 -> 64), norm0's scale folded into the weights.
    kp0, np0 = 256, 128                                   # K=147 -> 256, N=64 -> 128
    p["conv0_w"] = (g.normal((kp0, np0), (2.0 / 147.0) ** 0.5) * _S2_FOLD
                    ).astype(jnp.bfloat16)
    p["conv0_b"] = _bn_affine(INIT_FEATURES, np0)[1]      # norm0 bias
    # Rows >= 147 multiply zero-padded input columns and cols >= 64 are
    # sliced off, so they need not be zeroed.

    # --- dense blocks + transitions
    c = INIT_FEATURES
    blocks = []
    for bi, n_layers in enumerate(BLOCK_CONFIG):
        layers = []
        for _ in range(n_layers):
            kp = _ru(c, 256)
            width = BN_SIZE * GROWTH                      # 128
            layers.append({
                "n1": _bn_affine(c, kp),                  # norm1 (pre-activation)
                # conv1 (1x1, c -> 128) with norm2's scale folded in.
                "w1": (g.normal((kp, width), (2.0 / c) ** 0.5) * _S2_FOLD
                       ).astype(jnp.bfloat16),
                "b2": jnp.asarray(np.full((1, width), _BN_BETA, np.float32)),
                # conv2 (3x3, 128 -> 32); raw output, later layers normalize it.
                "w2": g.normal((3, 3, width, GROWTH),
                               (2.0 / (9.0 * width)) ** 0.5).astype(jnp.bfloat16),
            })
            c += GROWTH
        blocks.append(layers)
        if bi < len(BLOCK_CONFIG) - 1:
            kp = _ru(c, 256)
            p[f"trans{bi + 1}"] = {
                "n": _bn_affine(c, kp),
                "w": g.normal((kp, c // 2), (2.0 / c) ** 0.5).astype(jnp.bfloat16),
            }
            c //= 2
    p["blocks"] = blocks

    # --- final norm5 + classifier (Linear(1920, classCount) + Sigmoid)
    p["n5"] = _bn_affine(c, c)                            # c == 1920
    p["fc_w"] = g.normal((c, class_count), (1.0 / c) ** 0.5).astype(jnp.bfloat16)
    p["fc_b"] = jnp.zeros((1, class_count), jnp.float32)
    return p


# ----------------------------------------------------------------------------
# Forward pass (matches torchvision densenet201 + Linear + Sigmoid head)
# ----------------------------------------------------------------------------
def dense_layer(x, lp):
    N, H, W, C = x.shape
    # norm1 -> relu -> conv1(1x1) -> norm2 -> relu, fused into one matmul call
    bott = fused_matmul(x.reshape(N * H * W, C), lp["w1"],
                        in_aff=lp["n1"], out_b=lp["b2"], out_relu=True)
    bott = bott.reshape(N, H, W, BN_SIZE * GROWTH)
    new = conv3x3(bott, lp["w2"])                         # conv2 (3x3)
    return jnp.concatenate([x, new], axis=-1)             # dense connectivity


def transition(x, tp):
    N, H, W, C = x.shape
    y = fused_matmul(x.reshape(N * H * W, C), tp["w"], in_aff=tp["n"])
    y = y.reshape(N, H, W, C // 2)
    return avgpool2x2(y)


def densenet201_forward(x_nchw, p):
    x = jnp.transpose(x_nchw, (0, 2, 3, 1)).astype(jnp.float32)      # NHWC
    # stem: conv0 (7x7 s2 p3) + norm0 + relu0  (im2col + fused matmul kernel)
    cols, (N, Ho, Wo) = _im2col(x, 7, 7, 2, 3)
    y = fused_matmul(cols, p["conv0_w"], out_b=p["conv0_b"], out_relu=True)
    x = y[:, :INIT_FEATURES].reshape(N, Ho, Wo, INIT_FEATURES)
    x = maxpool3x3_s2(x)                                             # pool0

    for bi, layers in enumerate(p["blocks"]):
        for lp in layers:
            x = dense_layer(x, lp)
        if bi < len(p["blocks"]) - 1:
            x = transition(x, p[f"trans{bi + 1}"])

    # norm5 + relu + adaptive avg pool (1,1) + Linear + Sigmoid
    N2, H, W, C = x.shape
    head = _build_head(N2, H * W, C, p["fc_w"].shape[1])
    return head(x.reshape(N2, H * W, C), p["n5"][0], p["n5"][1],
                p["fc_w"], p["fc_b"])


# ----------------------------------------------------------------------------
if __name__ == "__main__":
    key = jax.random.PRNGKey(0)
    kx, kp = jax.random.split(key)

    # NCHW input; 32x32 is the smallest spatial size that survives the /32
    # downsampling (conv0 + pool0 + 3 transition avg-pools) of densenet201.
    x = jax.random.normal(kx, (2, 3, 32, 32), jnp.float32)
    params = make_densenet201_params(kp, CLASS_COUNT)

    out = jax.block_until_ready(densenet201_forward(x, params))

    assert out.shape == (2, CLASS_COUNT)
    assert bool(jnp.all(jnp.isfinite(out)))
    assert bool(jnp.all((out >= 0.0) & (out <= 1.0)))  # sigmoid range
    print("KERNEL_OK")
</pallas_src>

<mosaic_0001>
module attributes {stable_mosaic.version = 11 : i64} {
  func.func @_mm_kernel(%arg0: i32, %arg1: i32, %arg2: i32, %arg3: memref<256x256xbf16, #tpu.memory_space<vmem>>, %arg4: memref<1x256xf32, #tpu.memory_space<vmem>>, %arg5: memref<1x256xf32, #tpu.memory_space<vmem>>, %arg6: memref<256x128xbf16, #tpu.memory_space<vmem>>, %arg7: memref<1x128xf32, #tpu.memory_space<vmem>>, %arg8: memref<256x128xbf16, #tpu.memory_space<vmem>>, %arg9: memref<256x128xf32, #tpu.memory_space<vmem>>) attributes {dimension_semantics = [#tpu.dimension_semantics<parallel>, #tpu.dimension_semantics<parallel>, #tpu.dimension_semantics<arbitrary>], iteration_bounds = array<i64: 2, 1, 1>, scalar_prefetch = 0 : i64, scratch_operands = 1 : i64, tpu.core_type = #tpu.core_type<tc>, window_params = [{transform_indices = @transform_0, window_bounds = array<i64: 256, 256>}, {transform_indices = @transform_1, window_bounds = array<i64: 1, 256>}, {transform_indices = @transform_2, window_bounds = array<i64: 1, 256>}, {transform_indices = @transform_3, window_bounds = array<i64: 256, 128>}, {transform_indices = @transform_4, window_bounds = array<i64: 1, 128>}, {transform_indices = @transform_5, window_bounds = array<i64: 256, 128>}]} {
    %c0_i32 = arith.constant 0 : i32
    %0 = arith.cmpi eq, %arg2, %c0_i32 : i32
    %1 = arith.extui %0 : i1 to i32
    %c0_i32_0 = arith.constant 0 : i32
    %2 = arith.cmpi ne, %1, %c0_i32_0 : i32
    scf.if %2 {
      %cst_10 = arith.constant 0.000000e+00 : f32
      %12 = vector.broadcast %cst_10 : f32 to vector<256x128xf32>
      %c0_11 = arith.constant 0 : index
      %c0_12 = arith.constant 0 : index
      %13 = vector.load %arg9[%c0_11, %c0_12] : memref<256x128xf32, #tpu.memory_space<vmem>>, vector<256x128xf32>
      tpu.vector_store %arg9[%c0_11, %c0_12], %12 {strides = array<i32>} : memref<256x128xf32, #tpu.memory_space<vmem>>, vector<256x128xf32>,
    } else {
    }
    %c0 = arith.constant 0 : index
    %c0_1 = arith.constant 0 : index
    %3 = vector.load %arg3[%c0, %c0_1] : memref<256x256xbf16, #tpu.memory_space<vmem>>, vector<256x256xbf16>
    %c0_2 = arith.constant 0 : index
    %c0_3 = arith.constant 0 : index
    %4 = vector.load %arg9[%c0_2, %c0_3] : memref<256x128xf32, #tpu.memory_space<vmem>>, vector<256x128xf32>
    %c0_4 = arith.constant 0 : index
    %c0_5 = arith.constant 0 : index
    %5 = vector.load %arg6[%c0_4, %c0_5] : memref<256x128xbf16, #tpu.memory_space<vmem>>, vector<256x128xbf16>
    %cst = arith.constant dense<0.000000e+00> : vector<256x128xf32>
    %6 = tpu.matmul %3, %5, %cst {dimension_numbers = #tpu.dot_dimension_numbers<[1], [0], [0], [1], [0, 0, 1, 1], [], []>} : vector<256x256xbf16>, vector<256x128xbf16>, vector<256x128xf32> -> vector<256x128xf32>
    %7 = arith.addf %4, %6 : vector<256x128xf32>
    %c0_6 = arith.constant 0 : index
    %c0_7 = arith.constant 0 : index
    %8 = vector.load %arg9[%c0_6, %c0_7] : memref<256x128xf32, #tpu.memory_space<vmem>>, vector<256x128xf32>
    tpu.vector_store %arg9[%c0_6, %c0_7], %7 {strides = array<i32>} : memref<256x128xf32, #tpu.memory_space<vmem>>, vector<256x128xf32>,
    %c0_i32_8 = arith.constant 0 : i32
    %9 = arith.cmpi eq, %arg2, %c0_i32_8 : i32
    %10 = arith.extui %9 : i1 to i32
    %c0_i32_9 = arith.constant 0 : i32
    %11 = arith.cmpi ne, %10, %c0_i32_9 : i32
    scf.if %11 {
      %c0_10 = arith.constant 0 : index
      %c0_11 = arith.constant 0 : index
      %12 = vector.load %arg9[%c0_10, %c0_11] : memref<256x128xf32, #tpu.memory_space<vmem>>, vector<256x128xf32>
      %c0_12 = arith.constant 0 : index
      %c0_13 = arith.constant 0 : index
      %13 = vector.load %arg7[%c0_12, %c0_13] : memref<1x128xf32, #tpu.memory_space<vmem>>, vector<1x128xf32>
      %14 = vector.broadcast %13 : vector<1x128xf32> to vector<256x128xf32>
      %15 = arith.addf %12, %14 : vector<256x128xf32>
      %cst_14 = arith.constant 0.000000e+00 : f32
      %16 = vector.broadcast %cst_14 : f32 to vector<256x128xf32>
      %17 = arith.maximumf %15, %16 : vector<256x128xf32>
      %18 = arith.truncf %17 : vector<256x128xf32> to vector<256x128xbf16>
      %c0_15 = arith.constant 0 : index
      %c0_16 = arith.constant 0 : index
      %19 = vector.load %arg8[%c0_15, %c0_16] : memref<256x128xbf16, #tpu.memory_space<vmem>>, vector<256x128xbf16>
      tpu.vector_store %arg8[%c0_15, %c0_16], %18 {strides = array<i32>} : memref<256x128xbf16, #tpu.memory_space<vmem>>, vector<256x128xbf16>,
    } else {
    }
    return
  }
  func.func @transform_0(%arg0: i32, %arg1: i32, %arg2: i32) -> (i32, i32) {
    %c0_i32 = arith.constant 0 : i32
    return %arg0, %arg2 : i32, i32
  }
  func.func @transform_1(%arg0: i32, %arg1: i32, %arg2: i32) -> (i32, i32) {
    %c0_i32 = arith.constant 0 : i32
    %c0_i32_0 = arith.constant 0 : i32
    return %c0_i32, %arg2 : i32, i32
  }
  func.func @transform_2(%arg0: i32, %arg1: i32, %arg2: i32) -> (i32, i32) {
    %c0_i32 = arith.constant 0 : i32
    %c0_i32_0 = arith.constant 0 : i32
    return %c0_i32, %arg2 : i32, i32
  }
  func.func @transform_3(%arg0: i32, %arg1: i32, %arg2: i32) -> (i32, i32) {
    %c0_i32 = arith.constant 0 : i32
    return %arg2, %arg1 : i32, i32
  }
  func.func @transform_4(%arg0: i32, %arg1: i32, %arg2: i32) -> (i32, i32) {
    %c0_i32 = arith.constant 0 : i32
    %c0_i32_0 = arith.constant 0 : i32
    return %c0_i32, %arg1 : i32, i32
  }
  func.func @transform_5(%arg0: i32, %arg1: i32, %arg2: i32) -> (i32, i32) {
    %c0_i32 = arith.constant 0 : i32
    return %arg0, %arg1 : i32, i32
  }
}

</mosaic_0001>

<bundles_post_ra>
// kernel: tpu_custom_call.1
= control target key start
LH: loop header
LB: loop body
LE: loop exit
PB: predicated region body
PF: predicated region fallthrough
CT: control target
= control target key end

     0   :  { %10 = vsyncpa [#allocation4], 0  ;;  %s2383_s0 = inlined_call_operand.hbm [shape: bf16[512,256], index: 0, kind: input, shape index: {}]   ;;  %s2384_s1 = inlined_call_operand.vmem [shape: f32[1,256], index: 1, kind: input, shape index: {}]   ;;  %s2385_s2 = inlined_call_operand.vmem [shape: f32[1,256], index: 2, kind: input, shape index: {}]   ;;  %s2386_s3 = inlined_call_operand.hbm [shape: bf16[256,128], index: 3, kind: input, shape index: {}]   ;;  %s2387_s4 = inlined_call_operand.vmem [shape: f32[1,128], index: 4, kind: input, shape index: {}]   ;;  %s2388_s5 = inlined_call_operand.hbm [shape: bf16[512,128], index: 5, kind: output, shape index: {}]  }
   0x1   :  { %12 = vsyncpa [#allocation4 + $0x1], 0 }
   0x2   :  { %13 = vsyncpa [#allocation7], 0 }
   0x3   :  { %14 = vsyncpa [#allocation5], 0 }
   0x4   :  { %16 = vsyncpa [#allocation5 + $0x1], 0  ;;  %s2073_s18 = smov 0   ;;  %s2075_s1 = smov 0  }
   0x5   :  { %s2077_s19 = smov 0   ;;  %s2079_s2 = smov 0  }
   0x6   :  { %s2081_s20 = smov 0   ;;  %s2083_s21 = smov 0  }
   0x7 LB: > { %s1385_s22 = sadd.s32 4294967295, %s2032_s21   ;;  %s1386_s23 = sadd.s32 4294967294, %s2032_s21   ;;  %s2032_s21 = sphi %s2083_s21, %s22_s21   ;;  %s2028_s20 = sphi %s2081_s20, %s2412_s20   ;;  %s2024_s2 = sphi %s2079_s2, %s2411_s2   ;;  %s2020_s19 = sphi %s2077_s19, %s2410_s19   ;;  %s2016_s1 = sphi %s2075_s1, %s2409_s1   ;;  %s2012_s18 = sphi %s2073_s18, %s2408_s18  }
   0x8   : > { %p63_p0 = scmp.ne.s32.totalorder %s2016_s1, %s2012_s18  ;;  %p2107_p1 = scmp.eq.s32.totalorder %s1385_s22, 0 }
   0x9   : > { %p2111_p2 = scmp.eq.s32.totalorder %s1385_s22, 1  ;;  %p201_p3 = scmp.eq.s32.totalorder %s1386_s23, 1 }
   0xa   : > { %s2393_s24 = scalar_select %p2107_p1, 1, 0 }
   0xb   : > { %s2394_s25 = scalar_select %p2111_p2, 1, 0 }
   0xc   : > { %p2117_p4 = por %p2107_p1, %p63_p0  ;;  %p1387_p5 = scmp.ge.s32.totalorder %s2032_s21, 1 }
   0xd   : > { %p2122_p6 = por %p201_p3, %p63_p0  ;;  %p208_p7 = scmp.lt.s32.totalorder %s2032_s21, 3 }
   0xe   : > { %s2395_s26 = scalar_select %p2117_p4, 1, 0 }
   0xf   : > { %s2396_s27 = scalar_select %p2122_p6, 1, 0 }
  0x10   : > { %p2127_p8 = pnand %p1387_p5, %p208_p7  ;;  %s2034_s29 = smov [#allocation6]  }
  0x11   : > { %s240_s30 = sshll.u32 %s2034_s29, 4  ;;  %s41_s7 = sadd.s32 1, %s2028_s20  ;;  %s241_s30 = int_to_ptr.vmem [resolvable:$true] %s240_s30 }
  0x12   : > { %s2397_s28 = scalar_select %p2127_p8, 1, 0 }
  0x13   : > { %p1753_p9 = pneg %p2127_p8  ;;  %s1888_s10 = scalar_lea.hbm %s2386_s3, 2048 }
  0x14   : > { %p1889_p12 = scmp.ne.s32.totalorder %s2386_s3, %s1888_s10  ;;  %p1895_p5 = scmp.lt.u32.totalorder %s1888_s10, %s2386_s3 }
  0x15   : > { %p2136_p11 = pnand %p1753_p9, %p2107_p1 }
  0x17   : > { %p1890_p13 = pneg %p2136_p11 }
  0x19   : > { %p1891_p0 = pnand %p1890_p13, %p1889_p12 }
  0x1b   : > { %p1892_p3 = pneg %p1891_p0 }
  0x1d   : > { %p1897_p7 = pnand %p1895_p5, %p1892_p3 }
  0x1f   : > { %1900 = shalt.err (!%p1897_p7)
}
  0x20   : > { %s1901_s15 = scalar_lea.vmem %s241_s30, 2048  ;;  %p1909_p1 = scmp.lt.s32.totalorder %s241_s30, %s241_s30 }
  0x21   : > { %p1902_p9 = scmp.ne.s32.totalorder %s241_s30, %s1901_s15  ;;  %p1910_p4 = scmp.lt.s32.totalorder %s1901_s15, %s1901_s15 }
  0x23   : > { %p1904_p10 = pnand %p1902_p9, %p1890_p13  ;;  %p1911_p8 = por %p1910_p4, %p1909_p1 }
  0x25   : > { %p1905_p6 = pneg %p1904_p10 }
  0x27   : > { %p1912_p2 = pnand %p1911_p8, %p1905_p6 }
  0x29   : > { %1915 = shalt.err (!%p1912_p2)
}
  0x2a   : > { %s2035_s16 = smov 64   ;;  %s2036_s17 = smov 4  }
  0x2b   : > { %1756 = dma.hbm_to_vmem [thread:$0]  (!%p2136_p11), %s2386_s3, 2048, %s241_s30, [#allocation7], %s2035_s16, %s2035_s16, %s2036_s17  }
  0x2c   : > { %p43_p1 = scmp.ge.s32.totalorder %s41_s7, 2  ;;  %s50_s29 = sadd.s32 1, %s2020_s19 }
  0x2d   : > { %p57_p2 = scmp.ne.s32.totalorder %s2020_s19, %s2016_s1  ;;  %p58_p4 = scmp.eq.s32.totalorder %s2032_s21, 0 }
  0x2e   : > { %s2414_s7 = smov (%p43_p1, %s41_s7), 0  ;;  %p2400_p8 = scmp.ne.s32.totalorder %s2394_s25, 0 }
  0x2f   : > { %p2163_p6 = por %p58_p4, %p57_p2  ;;  %s45_s6 = ssub.s32 %s2028_s20, %s2414_s7 }
  0x30   : > { %p2169_p10 = por %p2400_p8, %p57_p2  ;;  %p1766_p12 = scmp.lt.s32.totalorder %s2032_s21, 2 }
  0x31   : > { %p48_p11 = scmp.eq.s32.totalorder %s45_s6, 0  ;;  %s260_s30 = sand.u32 1, %s2020_s19  }
  0x32   : > { %s1393_s10 = sshll.u32 %s260_s30, 8  ;;  %s1488_s12 = sshll.u32 %s2028_s20, 12 }
  0x33   : > { %s2178_s11 = scalar_select %p48_p11, %s2020_s19, %s50_s29  }
  0x34   : > { %s2184_s15 = scalar_lea.hbm %s2383_s0, %s1488_s12  ;;  %s264_s25 = scalar_lea.vmem [#allocation3], %s1393_s10 }
  0x35   : > { %s274_s16 = sshll.u32 %s264_s25, 4  ;;  %p2190_p13 = pnand %p1766_p12, %p2163_p6  ;;  %s2186_s16 = int_to_ptr.vmem [resolvable:$true] %s274_s16 }
  0x36   : > { %s2194_s22 = scalar_lea.sflag [#allocation4], %s260_s30  ;;  %s1916_s23 = scalar_lea.hbm %s2184_s15, 4096 }
  0x37   : > { %p1917_p0 = scmp.ne.s32.totalorder %s2184_s15, %s1916_s23  ;;  %p1918_p3 = pneg %p2190_p13 }
  0x38   : > { %s1921_s8 = scalar_lea.hbm %s2383_s0, 8192  ;;  %p1922_p9 = scmp.lt.u32.totalorder %s2184_s15, %s2383_s0 }
  0x39   : > { %p1919_p5 = pnand %p1918_p3, %p1917_p0  ;;  %p1923_p1 = scmp.lt.u32.totalorder %s1921_s8, %s1916_s23 }
  0x3a   : > { %p1925_p4 = scmp.lt.u32.totalorder %s1916_s23, %s2184_s15 }
  0x3b   : > { %p1920_p7 = pneg %p1919_p5  ;;  %p1924_p2 = por %p1923_p1, %p1922_p9 }
  0x3d   : > { %p1926_p6 = por %p1925_p4, %p1924_p2 }
  0x3f   : > { %p1927_p8 = pnand %p1926_p6, %p1920_p7 }
  0x41   : > { %1930 = shalt.err (!%p1927_p8)
}
  0x42   : > { %s1931_s30 = scalar_lea.vmem %s2186_s16, 4096  ;;  %s2037_s13 = smov [#allocation3]  }
  0x43   : > { %p1932_p12 = scmp.ne.s32.totalorder %s2186_s16, %s1931_s30  ;;  %s1936_s14 = sshll.u32 %s2037_s13, 4  ;;  %s1937_s14 = int_to_ptr.vmem [resolvable:$false] %s1936_s14 }
  0x44   : > { %s1938_s25 = scalar_lea.vmem %s1937_s14, 8192  ;;  %p1939_p5 = scmp.lt.s32.totalorder %s2186_s16, %s1937_s14 }
  0x45   : > { %p1934_p11 = pnand %p1932_p12, %p1918_p3  ;;  %p1940_p9 = scmp.lt.s32.totalorder %s1938_s25, %s1931_s30 }
  0x47   : > { %p1935_p0 = pneg %p1934_p11  ;;  %p1941_p1 = por %p1940_p9, %p1939_p5 }
  0x49   : > { %p1942_p2 = pnand %p1941_p1, %p1935_p0 }
  0x4b   : > { %1945 = shalt.err (!%p1942_p2)
}
  0x4c   : > { %s2038_s23 = smov 128   ;;  %s2039_s29 = smov 8  }
  0x4d   : > { %1760 = dma.hbm_to_vmem [thread:$0]  (!%p2190_p13), %s2184_s15, 4096, %s2186_s16, %s2194_s22, %s2038_s23, %s2038_s23, %s2039_s29  }
  0x4e   : > { %p2403_p3 = scmp.ne.s32.totalorder %s2397_s28, 0 }
  0x4f   : > { %s2225_s6 = sand.u32 (!%p2403_p3), 1, %s2016_s1   ;;  %p2404_p7 = scmp.ne.s32.totalorder (!%p2403_p3), %s2395_s26, 0 }
  0x50   : > { %286 = sbr.rel (%p2403_p3) target bundleno = 419 (0x1a3), region = 40  ;;  %s1398_s8 = sshll.u32 (!%p2403_p3), %s2225_s6, 8 }
  0x51   : > { %s289_s10 = scalar_lea.sflag (!%p2403_p3), [#allocation4], %s2225_s6  ;;  %s2229_s12 = scalar_lea.vmem (!%p2403_p3), [#allocation3], %s1398_s8 }
  0x57   : > { %1999 = dma.done.wait (%p2404_p7), %s289_s10, 4096  }
  0x58   : > { %2001 = vsyncadd (%p2404_p7), %s289_s10, 4294963200  ;;  %p2405_p13 = scmp.ne.s32.totalorder %s2393_s24, 0 }
  0x5a   : > { %2003 = dma.done.wait (%p2405_p13), [#allocation7], 2048  }
  0x5b   : > { %2005 = vsyncadd (%p2405_p13), [#allocation7], 4294965248  ;;  %v1824_v0 = vld [vmem:[#allocation6 + $0x40] sm:$0xff]   ;;  %v1826_v2 = vld [vmem:[#allocation6 + $0x48] sm:$0xff]   ;;  %s1400_s28 = sshll.u32 %s2225_s6, 7  ;;  %s1521_s16 = sshll.u32 %s2024_s2, 11 }
  0x5c   : > { %v1825_v1 = vld [vmem:[#allocation6] sm:$0xff]   ;;  %1617 = vmatprep.subr.bf16.mxu0 %v1824_v0  ;;  %1729 = vmatprep.subr.bf16.mxu1 %v1824_v0  ;;  %v1827_v3 = vld [vmem:[#allocation6 + $0x8] sm:$0xff]   ;;  %v1828_v4 = vld [vmem:[#allocation6 + $0x50] sm:$0xff]   ;;  %s2281_s15 = scalar_lea.vmem [#allocation8], %s1400_s28  ;;  %s2330_s13 = scalar_lea.hbm %s2388_s5, %s1521_s16 }
  0x5d   : > { %1618 = vmatpush3.bf16.msra.mxu0 %v1825_v1  ;;  %1737 = vmatpush3.bf16.msra.mxu1 %v1825_v1  ;;  %v1829_v5 = vld [vmem:[#allocation6 + $0x10] sm:$0xff]   ;;  %v1830_v6 = vld [vmem:[#allocation6 + $0x58] sm:$0xff]   ;;  %v1832_v8 = vld [vmem:[#allocation6 + $0x60] sm:$0xff]   ;;  %s1246_s17 = sshll.u32 %s2281_s15, 4  ;;  %s1232_s2 = scalar_lea.sflag [#allocation5], %s2225_s6  ;;  %s2332_s17 = int_to_ptr.vmem [resolvable:$true] %s1246_s17 }
  0x5e   : > { %1619 = vmatprep.subr.bf16.mxu0 %v1826_v2  ;;  %1730 = vmatprep.subr.bf16.mxu1 %v1826_v2  ;;  %v1831_v7 = vld [vmem:[#allocation6 + $0x18] sm:$0xff]   ;;  %v1833_v9 = vld [vmem:[#allocation6 + $0x20] sm:$0xff]   ;;  %v1834_v10 = vld [vmem:[#allocation6 + $0x68] sm:$0xff]   ;;  %s1946_s14 = scalar_lea.vmem %s2332_s17, 2048  ;;  %s2040_s25 = smov [#allocation8]  }
  0x5f   : > { %v1842_v11 = vld [vmem:[%s2229_s12 + $0x4] ss:$8 sps:$4 sm:$0xff]   ;;  %v1836_v14 = vld [vmem:[#allocation6 + $0x70] sm:$0xff]   ;;  %v1838_v16 = vld [vmem:[#allocation6 + $0x78] sm:$0xff]   ;;  %p1947_p4 = scmp.ne.s32.totalorder %s2332_s17, %s1946_s14  ;;  %s1950_s23 = sshll.u32 %s2040_s25, 4  ;;  %s1951_s23 = int_to_ptr.vmem [resolvable:$false] %s1950_s23 }
  0x60   : > { %v1845_v12 = vld [vmem:[%s2229_s12 + $0x84] ss:$8 sps:$4 sm:$0xff]   ;;  %772 = vmatprep.mubr.bf16.mxu0 %v1842_v11  ;;  %v1837_v15 = vld [vmem:[#allocation6 + $0x30] sm:$0xff]   ;;  %v1839_v17 = vld [vmem:[#allocation6 + $0x38] sm:$0xff]   ;;  %s1952_s29 = scalar_lea.vmem %s1951_s23, 4096  ;;  %p1953_p12 = scmp.lt.s32.totalorder %s2332_s17, %s1951_s23 }
  0x61   : > { %1620 = vmatpush3.bf16.msra.mxu0 %v1827_v3  ;;  %1738 = vmatpush3.bf16.msra.mxu1 %v1827_v3  ;;  %v1835_v13 = vld [vmem:[#allocation6 + $0x28] sm:$0xff]   ;;  %v1846_v20 = vld [vmem:[%s2229_s12 + $0x14] ss:$8 sps:$4 sm:$0xff]   ;;  %v1850_v22 = vld [vmem:[%s2229_s12 + $0x10] ss:$8 sps:$4 sm:$0xff]   ;;  %p1948_p6 = pnand %p1947_p4, %p2169_p10  ;;  %p1954_p11 = scmp.lt.s32.totalorder %s1952_s29, %s1946_s14 }
  0x62   : > { %1621 = vmatprep.subr.bf16.mxu0 %v1828_v4  ;;  %1731 = vmatprep.subr.bf16.mxu1 %v1828_v4  ;;  %v1840_v18 = vld [vmem:[%s2229_s12] ss:$8 sps:$4 sm:$0xff]   ;;  %v1848_v21 = vld [vmem:[%s2229_s12 + $0x94] ss:$8 sps:$4 sm:$0xff]   ;;  %v1851_v23 = vld [vmem:[%s2229_s12 + $0x90] ss:$8 sps:$4 sm:$0xff]  }
  0x63   : > { %836 = vmatprep.mubr.bf16.mxu1 %v1845_v12  ;;  %v1843_v19 = vld [vmem:[%s2229_s12 + $0x80] ss:$8 sps:$4 sm:$0xff]   ;;  %v1852_v24 = vld [vmem:[%s2229_s12 + $0x24] ss:$8 sps:$4 sm:$0xff]   ;;  %v1858_v28 = vld [vmem:[%s2229_s12 + $0x34] ss:$8 sps:$4 sm:$0xff]   ;;  %p1949_p8 = pneg %p1948_p6  ;;  %p1955_p0 = por %p1954_p11, %p1953_p12 }
  0x64   : > { %v1854_v25 = vld [vmem:[%s2229_s12 + $0xa4] ss:$8 sps:$4 sm:$0xff]   ;;  %v1856_v26 = vld [vmem:[%s2229_s12 + $0x20] ss:$8 sps:$4 sm:$0xff]   ;;  %v1860_v29 = vld [vmem:[%s2229_s12 + $0xb4] ss:$8 sps:$4 sm:$0xff]  }
  0x65   : > { %1622 = vmatpush3.bf16.msra.mxu0 %v1829_v5  ;;  %1739 = vmatpush3.bf16.msra.mxu1 %v1829_v5  ;;  %v1857_v27 = vld [vmem:[%s2229_s12 + $0xa0] ss:$8 sps:$4 sm:$0xff]   ;;  %v1862_v30 = vld [vmem:[%s2229_s12 + $0x30] ss:$8 sps:$4 sm:$0xff]   ;;  %v1864_v32 = vld [vmem:[%s2229_s12 + $0x44] ss:$8 sps:$4 sm:$0xff]   ;;  %p1956_p5 = pnand %p1955_p0, %p1949_p8 }
  0x66   : > { %1623 = vmatprep.subr.bf16.mxu0 %v1830_v6  ;;  %1732 = vmatprep.subr.bf16.mxu1 %v1830_v6  ;;  %v1863_v31 = vld [vmem:[%s2229_s12 + $0xb0] ss:$8 sps:$4 sm:$0xff]   ;;  %v1866_v33 = vld [vmem:[%s2229_s12 + $0xc4] ss:$8 sps:$4 sm:$0xff]   ;;  %v1868_v34 = vld [vmem:[%s2229_s12 + $0x40] ss:$8 sps:$4 sm:$0xff]  }
  0x67   : > { %v1869_v35 = vld [vmem:[%s2229_s12 + $0xc0] ss:$8 sps:$4 sm:$0xff]   ;;  %v1870_v36 = vld [vmem:[%s2229_s12 + $0x54] ss:$8 sps:$4 sm:$0xff]   ;;  %v1874_v38 = vld [vmem:[%s2229_s12 + $0x50] ss:$8 sps:$4 sm:$0xff]  }
  0x68   : > { %v1872_v37 = vld [vmem:[%s2229_s12 + $0xd4] ss:$8 sps:$4 sm:$0xff]   ;;  %v1875_v39 = vld [vmem:[%s2229_s12 + $0xd0] ss:$8 sps:$4 sm:$0xff]   ;;  %v1876_v40 = vld [vmem:[%s2229_s12 + $0x64] ss:$8 sps:$4 sm:$0xff]  }
  0x69   : > { %1624 = vmatpush3.bf16.msra.mxu0 %v1831_v7  ;;  %1740 = vmatpush3.bf16.msra.mxu1 %v1831_v7  ;;  %v1878_v41 = vld [vmem:[%s2229_s12 + $0xe4] ss:$8 sps:$4 sm:$0xff]   ;;  %v1880_v42 = vld [vmem:[%s2229_s12 + $0x60] ss:$8 sps:$4 sm:$0xff]   ;;  %v1882_v44 = vld [vmem:[%s2229_s12 + $0x74] ss:$8 sps:$4 sm:$0xff]  }
  0x6a   : > { %1625 = vmatprep.subr.bf16.mxu0 %v1832_v8  ;;  %1733 = vmatprep.subr.bf16.mxu1 %v1832_v8  ;;  %v1881_v43 = vld [vmem:[%s2229_s12 + $0xe0] ss:$8 sps:$4 sm:$0xff]   ;;  %v1884_v45 = vld [vmem:[%s2229_s12 + $0xf4] ss:$8 sps:$4 sm:$0xff]   ;;  %v1886_v46 = vld [vmem:[%s2229_s12 + $0x70] ss:$8 sps:$4 sm:$0xff]  }
  0x6b   : > { %v1887_v47 = vld [vmem:[%s2229_s12 + $0xf0] ss:$8 sps:$4 sm:$0xff]   ;;  %v2274_v51 = vld [vmem:[%s2387_s4] ss:$0 sm:$0xff] }
  0x6d   : > { %1626 = vmatpush3.bf16.msra.mxu0 %v1833_v9  ;;  %1741 = vmatpush3.bf16.msra.mxu1 %v1833_v9 }
  0x6e   : > { %1627 = vmatprep.subr.bf16.mxu0 %v1834_v10  ;;  %1734 = vmatprep.subr.bf16.mxu1 %v1834_v10 }
  0x71   : > { %1628 = vmatpush3.bf16.msra.mxu0 %v1835_v13  ;;  %1742 = vmatpush3.bf16.msra.mxu1 %v1835_v13 }
  0x72   : > { %1629 = vmatprep.subr.bf16.mxu0 %v1836_v14  ;;  %1735 = vmatprep.subr.bf16.mxu1 %v1836_v14 }
  0x75   : > { %1630 = vmatpush3.bf16.msra.mxu0 %v1837_v15  ;;  %1743 = vmatpush3.bf16.msra.mxu1 %v1837_v15 }
  0x76   : > { %1631 = vmatprep.subr.bf16.mxu0 %v1838_v16  ;;  %1736 = vmatprep.subr.bf16.mxu1 %v1838_v16 }
  0x79   : > { %1632 = vmatpush3.bf16.msra.mxu0 %v1839_v17  ;;  %1744 = vmatpush3.bf16.msra.mxu1 %v1839_v17 }
  0x7c   : > { %773 = vmatmul.mubr.bf16.vlgmr.msra.gmra.mrb[0].mxu0 %v1840_v18  ;;  %837 = vmatmul.mubr.bf16.vlgmr.msra.gmra.mrb[0].mxu1 %v1843_v19 }
  0x7d   : > { %780 = vmatprep.mubr.bf16.mxu0 %v1846_v20  ;;  %844 = vmatprep.mubr.bf16.mxu1 %v1848_v21 }
  0x84   : > { %781 = vmatmul.mubr.bf16.gmra.mrb[4].mxu0 %v1850_v22  ;;  %845 = vmatmul.mubr.bf16.gmra.mrb[4].mxu1 %v1851_v23 }
  0x85   : > { %788 = vmatprep.mubr.bf16.mxu0 %v1852_v24  ;;  %852 = vmatprep.mubr.bf16.mxu1 %v1854_v25 }
  0x8c   : > { %789 = vmatmul.mubr.bf16.gmra.mrb[8].mxu0 %v1856_v26  ;;  %853 = vmatmul.mubr.bf16.gmra.mrb[8].mxu1 %v1857_v27 }
  0x8d   : > { %796 = vmatprep.mubr.bf16.mxu0 %v1858_v28  ;;  %860 = vmatprep.mubr.bf16.mxu1 %v1860_v29 }
  0x94   : > { %797 = vmatmul.mubr.bf16.gmra.mrb[12].mxu0 %v1862_v30  ;;  %861 = vmatmul.mubr.bf16.gmra.mrb[12].mxu1 %v1863_v31 }
  0x95   : > { %804 = vmatprep.mubr.bf16.mxu0 %v1864_v32  ;;  %868 = vmatprep.mubr.bf16.mxu1 %v1866_v33 }
  0x9c   : > { %805 = vmatmul.mubr.bf16.gmra.mrb[16].mxu0 %v1868_v34  ;;  %869 = vmatmul.mubr.bf16.gmra.mrb[16].mxu1 %v1869_v35 }
  0x9d   : > { %812 = vmatprep.mubr.bf16.mxu0 %v1870_v36  ;;  %876 = vmatprep.mubr.bf16.mxu1 %v1872_v37 }
  0xa4   : > { %813 = vmatmul.mubr.bf16.gmra.mrb[20].mxu0 %v1874_v38  ;;  %877 = vmatmul.mubr.bf16.gmra.mrb[20].mxu1 %v1875_v39 }
  0xa5   : > { %820 = vmatprep.mubr.bf16.mxu0 %v1876_v40  ;;  %884 = vmatprep.mubr.bf16.mxu1 %v1878_v41 }
  0xac   : > { %821 = vmatmul.mubr.bf16.gmra.mrb[24].mxu0 %v1880_v42  ;;  %885 = vmatmul.mubr.bf16.gmra.mrb[24].mxu1 %v1881_v43 }
  0xad   : > { %828 = vmatprep.mubr.bf16.mxu0 %v1882_v44  ;;  %892 = vmatprep.mubr.bf16.mxu1 %v1884_v45 }
  0xb4   : > { %829 = vmatmul.mubr.bf16.gmra.mrb[28].mxu0 %v1886_v46  ;;  %893 = vmatmul.mubr.bf16.gmra.mrb[28].mxu1 %v1887_v47 }
 0x14f   : > { %v1633_v48 = vpop.f32.mrb[0].mxu0  ;;  %v1681_v49 = vpop.f32.mrb[0].mxu1 }
 0x150   : > { %v1634_v50 = vpop.f32.mrb[1].mxu0  ;;  %v1682_v52 = vpop.f32.mrb[1].mxu1 }
 0x151   : > { %v1635_v53 = vadd.f32 %v1634_v50, %v1633_v48  ;;  %v1683_v54 = vadd.f32 %v1682_v52, %v1681_v49  ;;  %v1636_v55 = vpop.f32.mrb[2].mxu0  ;;  %v1684_v56 = vpop.f32.mrb[2].mxu1 }
 0x152   : > { %v1637_v57 = vpop.f32.mrb[3].mxu0  ;;  %v1685_v58 = vpop.f32.mrb[3].mxu1 }
 0x153   : > { %v1007_v59 = vadd.f32 %v1635_v53, %v2274_v51  ;;  %v1023_v60 = vadd.f32 %v1683_v54, %v2274_v51  ;;  %v1638_v61 = vadd.f32 %v1637_v57, %v1636_v55  ;;  %v1686_v62 = vadd.f32 %v1685_v58, %v1684_v56 }
 0x155   : > { %v1008_v63 = vadd.f32 %v1638_v61, %v2274_v51  ;;  %v1024_v0 = vadd.f32 %v1686_v62, %v2274_v51  ;;  %v1039_v1 = vmax.f32 %v1007_v59, 0.0  ;;  %v1055_v2 = vmax.f32 %v1023_v60, 0.0 }
 0x157   : > { %v1040_v3 = vmax.f32 %v1008_v63, 0.0  ;;  %v1056_v4 = vmax.f32 %v1024_v0, 0.0  ;;  %v1639_v5 = vpop.f32.mrb[4].mxu0  ;;  %v1687_v6 = vpop.f32.mrb[4].mxu1 }
 0x158   : > { %v1640_v7 = vpop.f32.mrb[5].mxu0  ;;  %v1688_v8 = vpop.f32.mrb[5].mxu1 }
 0x159   : > { %v1525_v9 = vpack.c.bf16 %v1040_v3, %v1039_v1  ;;  %v1565_v10 = vpack.c.bf16 %v1056_v4, %v1055_v2  ;;  %v1641_v11 = vadd.f32 %v1640_v7, %v1639_v5  ;;  %v1689_v12 = vadd.f32 %v1688_v8, %v1687_v6  ;;  %v1642_v13 = vpop.f32.mrb[6].mxu0  ;;  %v1690_v14 = vpop.f32.mrb[6].mxu1 }
 0x15a   : > { %v1643_v15 = vpop.f32.mrb[7].mxu0  ;;  %v1691_v16 = vpop.f32.mrb[7].mxu1 }
 0x15b   : > { %1526 = vst [vmem:[%s2281_s15] sm:$0xff] %v1525_v9   ;;  %1609 = vst [vmem:[%s2281_s15 + $0x40] sm:$0xff] %v1565_v10   ;;  %v1009_v17 = vadd.f32 %v1641_v11, %v2274_v51  ;;  %v1025_v18 = vadd.f32 %v1689_v12, %v2274_v51  ;;  %v1644_v19 = vadd.f32 %v1643_v15, %v1642_v13 }
 0x15c   : > { %v1692_v20 = vadd.f32 %v1691_v16, %v1690_v14 }
 0x15d   : > { %v1010_v21 = vadd.f32 %v1644_v19, %v2274_v51  ;;  %v1041_v23 = vmax.f32 %v1009_v17, 0.0  ;;  %v1057_v24 = vmax.f32 %v1025_v18, 0.0 }
 0x15e   : > { %v1026_v22 = vadd.f32 %v1692_v20, %v2274_v51 }
 0x15f   : > { %v1042_v25 = vmax.f32 %v1010_v21, 0.0  ;;  %v1645_v27 = vpop.f32.mrb[8].mxu0  ;;  %v1693_v28 = vpop.f32.mrb[8].mxu1 }
 0x160   : > { %v1058_v26 = vmax.f32 %v1026_v22, 0.0  ;;  %v1646_v29 = vpop.f32.mrb[9].mxu0  ;;  %v1694_v30 = vpop.f32.mrb[9].mxu1 }
 0x161   : > { %v1530_v31 = vpack.c.bf16 %v1042_v25, %v1041_v23  ;;  %v1647_v33 = vadd.f32 %v1646_v29, %v1645_v27  ;;  %v1695_v34 = vadd.f32 %v1694_v30, %v1693_v28  ;;  %v1648_v35 = vpop.f32.mrb[10].mxu0  ;;  %v1696_v36 = vpop.f32.mrb[10].mxu1 }
 0x162   : > { %v1570_v32 = vpack.c.bf16 %v1058_v26, %v1057_v24  ;;  %v1649_v37 = vpop.f32.mrb[11].mxu0  ;;  %v1697_v38 = vpop.f32.mrb[11].mxu1 }
 0x163   : > { %1602 = vst [vmem:[%s2281_s15 + $0x8] sm:$0xff] %v1530_v31   ;;  %v1011_v39 = vadd.f32 %v1647_v33, %v2274_v51  ;;  %v1027_v40 = vadd.f32 %v1695_v34, %v2274_v51  ;;  %v1650_v41 = vadd.f32 %v1649_v37, %v1648_v35  ;;  %v1698_v42 = vadd.f32 %v1697_v38, %v1696_v36 }
 0x164   : > { %1610 = vst [vmem:[%s2281_s15 + $0x48] sm:$0xff] %v1570_v32  }
 0x165   : > { %v1012_v43 = vadd.f32 %v1650_v41, %v2274_v51  ;;  %v1028_v44 = vadd.f32 %v1698_v42, %v2274_v51  ;;  %v1043_v45 = vmax.f32 %v1011_v39, 0.0  ;;  %v1059_v46 = vmax.f32 %v1027_v40, 0.0 }
 0x167   : > { %v1044_v47 = vmax.f32 %v1012_v43, 0.0  ;;  %v1060_v48 = vmax.f32 %v1028_v44, 0.0  ;;  %v1651_v49 = vpop.f32.mrb[12].mxu0  ;;  %v1699_v50 = vpop.f32.mrb[12].mxu1 }
 0x168   : > { %v1652_v52 = vpop.f32.mrb[13].mxu0  ;;  %v1700_v53 = vpop.f32.mrb[13].mxu1 }
 0x169   : > { %v1535_v54 = vpack.c.bf16 %v1044_v47, %v1043_v45  ;;  %v1575_v55 = vpack.c.bf16 %v1060_v48, %v1059_v46  ;;  %v1653_v56 = vadd.f32 %v1652_v52, %v1651_v49  ;;  %v1701_v57 = vadd.f32 %v1700_v53, %v1699_v50  ;;  %v1654_v58 = vpop.f32.mrb[14].mxu0  ;;  %v1702_v59 = vpop.f32.mrb[14].mxu1 }
 0x16a   : > { %v1655_v60 = vpop.f32.mrb[15].mxu0  ;;  %v1703_v61 = vpop.f32.mrb[15].mxu1 }
 0x16b   : > { %1603 = vst [vmem:[%s2281_s15 + $0x10] sm:$0xff] %v1535_v54   ;;  %1611 = vst [vmem:[%s2281_s15 + $0x50] sm:$0xff] %v1575_v55   ;;  %v1013_v62 = vadd.f32 %v1653_v56, %v2274_v51  ;;  %v1029_v63 = vadd.f32 %v1701_v57, %v2274_v51  ;;  %v1656_v0 = vadd.f32 %v1655_v60, %v1654_v58 }
 0x16c   : > { %v1704_v1 = vadd.f32 %v1703_v61, %v1702_v59 }
 0x16d   : > { %v1014_v2 = vadd.f32 %v1656_v0, %v2274_v51  ;;  %v1045_v4 = vmax.f32 %v1013_v62, 0.0  ;;  %v1061_v5 = vmax.f32 %v1029_v63, 0.0 }
 0x16e   : > { %v1030_v3 = vadd.f32 %v1704_v1, %v2274_v51 }
 0x16f   : > { %v1046_v6 = vmax.f32 %v1014_v2, 0.0  ;;  %v1657_v8 = vpop.f32.mrb[16].mxu0  ;;  %v1705_v9 = vpop.f32.mrb[16].mxu1 }
 0x170   : > { %v1062_v7 = vmax.f32 %v1030_v3, 0.0  ;;  %v1658_v10 = vpop.f32.mrb[17].mxu0  ;;  %v1706_v11 = vpop.f32.mrb[17].mxu1 }
 0x171   : > { %v1540_v12 = vpack.c.bf16 %v1046_v6, %v1045_v4  ;;  %v1659_v14 = vadd.f32 %v1658_v10, %v1657_v8  ;;  %v1707_v15 = vadd.f32 %v1706_v11, %v1705_v9  ;;  %v1660_v16 = vpop.f32.mrb[18].mxu0  ;;  %v1708_v17 = vpop.f32.mrb[18].mxu1 }
 0x172   : > { %v1580_v13 = vpack.c.bf16 %v1062_v7, %v1061_v5  ;;  %v1661_v18 = vpop.f32.mrb[19].mxu0  ;;  %v1709_v19 = vpop.f32.mrb[19].mxu1 }
 0x173   : > { %1604 = vst [vmem:[%s2281_s15 + $0x18] sm:$0xff] %v1540_v12   ;;  %v1015_v20 = vadd.f32 %v1659_v14, %v2274_v51  ;;  %v1031_v21 = vadd.f32 %v1707_v15, %v2274_v51  ;;  %v1662_v22 = vadd.f32 %v1661_v18, %v1660_v16  ;;  %v1710_v23 = vadd.f32 %v1709_v19, %v1708_v17 }
 0x174   : > { %1612 = vst [vmem:[%s2281_s15 + $0x58] sm:$0xff] %v1580_v13  }
 0x175   : > { %v1016_v24 = vadd.f32 %v1662_v22, %v2274_v51  ;;  %v1032_v25 = vadd.f32 %v1710_v23, %v2274_v51  ;;  %v1047_v26 = vmax.f32 %v1015_v20, 0.0  ;;  %v1063_v27 = vmax.f32 %v1031_v21, 0.0 }
 0x177   : > { %v1048_v28 = vmax.f32 %v1016_v24, 0.0  ;;  %v1064_v29 = vmax.f32 %v1032_v25, 0.0  ;;  %v1663_v30 = vpop.f32.mrb[20].mxu0  ;;  %v1711_v31 = vpop.f32.mrb[20].mxu1 }
 0x178   : > { %v1664_v32 = vpop.f32.mrb[21].mxu0  ;;  %v1712_v33 = vpop.f32.mrb[21].mxu1 }
 0x179   : > { %v1545_v34 = vpack.c.bf16 %v1048_v28, %v1047_v26  ;;  %v1585_v35 = vpack.c.bf16 %v1064_v29, %v1063_v27  ;;  %v1665_v36 = vadd.f32 %v1664_v32, %v1663_v30  ;;  %v1713_v37 = vadd.f32 %v1712_v33, %v1711_v31  ;;  %v1666_v38 = vpop.f32.mrb[22].mxu0  ;;  %v1714_v39 = vpop.f32.mrb[22].mxu1 }
 0x17a   : > { %v1667_v40 = vpop.f32.mrb[23].mxu0  ;;  %v1715_v41 = vpop.f32.mrb[23].mxu1 }
 0x17b   : > { %1605 = vst [vmem:[%s2281_s15 + $0x20] sm:$0xff] %v1545_v34   ;;  %1613 = vst [vmem:[%s2281_s15 + $0x60] sm:$0xff] %v1585_v35   ;;  %v1017_v42 = vadd.f32 %v1665_v36, %v2274_v51  ;;  %v1033_v43 = vadd.f32 %v1713_v37, %v2274_v51  ;;  %v1668_v44 = vadd.f32 %v1667_v40, %v1666_v38 }
 0x17c   : > { %v1716_v45 = vadd.f32 %v1715_v41, %v1714_v39 }
 0x17d   : > { %v1018_v46 = vadd.f32 %v1668_v44, %v2274_v51  ;;  %v1049_v48 = vmax.f32 %v1017_v42, 0.0  ;;  %v1065_v49 = vmax.f32 %v1033_v43, 0.0 }
 0x17e   : > { %v1034_v47 = vadd.f32 %v1716_v45, %v2274_v51 }
 0x17f   : > { %v1050_v50 = vmax.f32 %v1018_v46, 0.0  ;;  %v1669_v53 = vpop.f32.mrb[24].mxu0  ;;  %v1717_v54 = vpop.f32.mrb[24].mxu1 }
 0x180   : > { %v1066_v52 = vmax.f32 %v1034_v47, 0.0  ;;  %v1670_v55 = vpop.f32.mrb[25].mxu0  ;;  %v1718_v56 = vpop.f32.mrb[25].mxu1 }
 0x181   : > { %v1550_v57 = vpack.c.bf16 %v1050_v50, %v1049_v48  ;;  %v1671_v59 = vadd.f32 %v1670_v55, %v1669_v53  ;;  %v1719_v60 = vadd.f32 %v1718_v56, %v1717_v54  ;;  %v1672_v61 = vpop.f32.mrb[26].mxu0  ;;  %v1720_v62 = vpop.f32.mrb[26].mxu1 }
 0x182   : > { %v1590_v58 = vpack.c.bf16 %v1066_v52, %v1065_v49  ;;  %v1673_v63 = vpop.f32.mrb[27].mxu0  ;;  %v1721_v0 = vpop.f32.mrb[27].mxu1 }
 0x183   : > { %1606 = vst [vmem:[%s2281_s15 + $0x28] sm:$0xff] %v1550_v57   ;;  %v1019_v1 = vadd.f32 %v1671_v59, %v2274_v51  ;;  %v1035_v2 = vadd.f32 %v1719_v60, %v2274_v51  ;;  %v1674_v3 = vadd.f32 %v1673_v63, %v1672_v61  ;;  %v1722_v4 = vadd.f32 %v1721_v0, %v1720_v62 }
 0x184   : > { %1614 = vst [vmem:[%s2281_s15 + $0x68] sm:$0xff] %v1590_v58  }
 0x185   : > { %v1020_v5 = vadd.f32 %v1674_v3, %v2274_v51  ;;  %v1036_v6 = vadd.f32 %v1722_v4, %v2274_v51  ;;  %v1051_v7 = vmax.f32 %v1019_v1, 0.0  ;;  %v1067_v8 = vmax.f32 %v1035_v2, 0.0 }
 0x187   : > { %v1052_v9 = vmax.f32 %v1020_v5, 0.0  ;;  %v1068_v10 = vmax.f32 %v1036_v6, 0.0  ;;  %v1675_v11 = vpop.f32.mrb[28].mxu0  ;;  %v1723_v12 = vpop.f32.mrb[28].mxu1 }
 0x188   : > { %v1676_v13 = vpop.f32.mrb[29].mxu0  ;;  %v1724_v14 = vpop.f32.mrb[29].mxu1 }
 0x189   : > { %v1555_v15 = vpack.c.bf16 %v1052_v9, %v1051_v7  ;;  %v1595_v16 = vpack.c.bf16 %v1068_v10, %v1067_v8  ;;  %v1677_v17 = vadd.f32 %v1676_v13, %v1675_v11  ;;  %v1725_v18 = vadd.f32 %v1724_v14, %v1723_v12  ;;  %v1678_v19 = vpop.f32.mrb[30].mxu0  ;;  %v1726_v20 = vpop.f32.mrb[30].mxu1 }
 0x18a   : > { %v1679_v21 = vpop.f32.mrb[31].mxu0  ;;  %v1727_v22 = vpop.f32.mrb[31].mxu1 }
 0x18b   : > { %1607 = vst [vmem:[%s2281_s15 + $0x30] sm:$0xff] %v1555_v15   ;;  %1615 = vst [vmem:[%s2281_s15 + $0x70] sm:$0xff] %v1595_v16   ;;  %v1021_v23 = vadd.f32 %v1677_v17, %v2274_v51  ;;  %v1037_v24 = vadd.f32 %v1725_v18, %v2274_v51  ;;  %v1680_v25 = vadd.f32 %v1679_v21, %v1678_v19 }
 0x18c   : > { %v1728_v26 = vadd.f32 %v1727_v22, %v1726_v20 }
 0x18d   : > { %v1022_v27 = vadd.f32 %v1680_v25, %v2274_v51  ;;  %v1053_v29 = vmax.f32 %v1021_v23, 0.0  ;;  %v1069_v30 = vmax.f32 %v1037_v24, 0.0 }
 0x18e   : > { %v1038_v28 = vadd.f32 %v1728_v26, %v2274_v51 }
 0x18f   : > { %v1054_v31 = vmax.f32 %v1022_v27, 0.0 }
 0x190   : > { %v1070_v32 = vmax.f32 %v1038_v28, 0.0 }
 0x191   : > { %v1560_v33 = vpack.c.bf16 %v1054_v31, %v1053_v29 }
 0x192   : > { %v1600_v34 = vpack.c.bf16 %v1070_v32, %v1069_v30 }
 0x193   : > { %1608 = vst [vmem:[%s2281_s15 + $0x38] sm:$0xff] %v1560_v33  }
 0x194   : > { %1616 = vst [vmem:[%s2281_s15 + $0x78] sm:$0xff] %v1600_v34  }
 0x195   : > { %1959 = shalt.err (!%p1956_p5)
}
 0x196   : > { %s1960_s8 = scalar_lea.hbm %s2330_s13, 2048  ;;  %s1964_s24 = scalar_lea.hbm %s2388_s5, 4096 }
 0x197   : > { %p1961_p9 = scmp.ne.s32.totalorder %s2330_s13, %s1960_s8  ;;  %p1965_p3 = scmp.lt.u32.totalorder %s2330_s13, %s2388_s5 }
 0x198   : > { %p1966_p7 = scmp.lt.u32.totalorder %s1964_s24, %s1960_s8  ;;  %p1968_p4 = scmp.lt.u32.totalorder %s1960_s8, %s2330_s13 }
 0x199   : > { %p1962_p1 = pnand %p1961_p9, %p2169_p10 }
 0x19a   : > { %p1967_p13 = por %p1966_p7, %p1965_p3 }
 0x19b   : > { %p1963_p2 = pneg %p1962_p1 }
 0x19c   : > { %p1969_p6 = por %p1968_p4, %p1967_p13 }
 0x19e   : > { %p1970_p8 = pnand %p1969_p6, %p1963_p2 }
 0x1a0   : > { %1973 = shalt.err (!%p1970_p8)
}
 0x1a1   : > { %s2041_s15 = smov 64   ;;  %s2042_s16 = smov 4  }
 0x1a2   : > { %1751 = dma.vmem_to_hbm [thread:$0]  (%p2169_p10), %s2332_s17, 2048, %s2330_s13, %s1232_s2, %s2041_s15, %s2041_s15, %s2042_s16  }
 0x1a3 PF: > { %s1261_s22 = sand.u32 1, %s2012_s18   ;;  %p2406_p12 = scmp.ne.s32.totalorder %s2396_s27, 0 }
 0x1a4   : > { %p2407_p11 = scmp.ge.s32.totalorder %s2032_s21, 2  ;;  %s1262_s30 = scalar_lea.sflag [#allocation5], %s1261_s22 }
 0x1a6   : > { %p1762_p0 = pnand %p2407_p11, %p2406_p12 }
 0x1a8   : > { %2007 = dma.done.wait (!%p1762_p0), %s1262_s30, 2048  }
 0x1a9   : > { %2009 = vsyncadd (!%p1762_p0), %s1262_s30, 4294965248  ;;  %s22_s21 = sadd.s32 1, %s2032_s21   ;;  %s2408_s18 = smov %s2016_s1 }
 0x1aa   : > { %p19_p5 = scmp.ge.s32.totalorder %s22_s21, 4   ;;  %s2409_s1 = smov %s2020_s19 }
 0x1ab   : > { %s2410_s19 = smov %s2178_s11  ;;  %s2411_s2 = smov %s2028_s20 }
 0x1ac   : > { %s2412_s20 = smov %s2414_s7  ;;  %21 = sbr.rel (!%p19_p5) target bundleno = 7 (0x7), region = 107 }
 0x1b3   :  { %1267 = vsyncpa [#allocation4], 1 }
 0x1b4   :  { %1269 = vsyncpa [#allocation4 + $0x1], 1 }
 0x1b5   :  { %1270 = vsyncpa [#allocation7], 1 }
 0x1b6   :  { %1271 = vsyncpa [#allocation5], 1 }
 0x1b7   :  { %1273 = vsyncpa [#allocation5 + $0x1], 1 }

</bundles_post_ra>
